<compile_context>
chip_gen: v5e
topology: v5e:2x2
jax: 0.10.0
libtpu: 0.0.40
codegen_flags: <defaults>
</compile_context>

<pallas_src>
import functools
import re

import jax
import jax.numpy as jnp
from jax import lax
from jax.experimental import pallas as pl
from jax.experimental.pallas import tpu as pltpu

_MIB = 1024 * 1024


def _tpu_generation():
    """Best-effort TPU generation from device_kind (e.g. 'TPU v6e' -> 6)."""
    try:
        kind = jax.devices()[0].device_kind.lower()
    except Exception:
        return None
    m = re.search(r"v(\d+)", kind)
    return int(m.group(1)) if m else None


def _vmem_capacity_bytes(gen):
    """Per-TensorCore VMEM budget basis for this generation."""
    cap = None
    try:
        info = pltpu.get_tpu_info()
        cap = getattr(info, "vmem_capacity_bytes", None)
        cap = int(cap) if cap else None
    except Exception:
        cap = None
    if gen is not None and gen >= 7:
        # v7x has 64 MiB per TensorCore; the query may report per-chip (2 TCs),
        # so clamp to the per-core figure to avoid VMEM OOM at compile time.
        return min(cap, 64 * _MIB) if cap else 64 * _MIB
    if cap:
        return cap
    if gen is not None:
        return 128 * _MIB   # v4/v5e/v6e class chips have 128 MiB physical VMEM
    return 64 * _MIB        # unknown backend: stay conservative


def _mm_scale_kernel_inplace(scale_ref, a_ref, b_ref, o_ref, *,
                             K, tk, compute_dtype, mask_k):
    """f32-output path: accumulate straight into the output tile."""
    k = pl.program_id(2)
    a = a_ref[...]
    b = b_ref[...]
    if mask_k:
        # K % tk != 0: zero the padded tail of the contraction axis on BOTH
        # operands so the last (partial) K-block contributes exactly zero.
        col = lax.broadcasted_iota(jnp.int32, a.shape, 1) + k * tk
        a = jnp.where(col < K, a, jnp.zeros_like(a))
        row = lax.broadcasted_iota(jnp.int32, b.shape, 0) + k * tk
        b = jnp.where(row < K, b, jnp.zeros_like(b))
    if compute_dtype is not None:
        a = a.astype(compute_dtype)
        b = b.astype(compute_dtype)
    partial = jnp.dot(a, b, preferred_element_type=jnp.float32)

    @pl.when(k == 0)
    def _():
        o_ref[...] = partial

    @pl.when(k != 0)
    def _():
        o_ref[...] += partial

    @pl.when(k == pl.num_programs(2) - 1)
    def _():
        o_ref[...] = o_ref[...] * scale_ref[0]


def _mm_scale_kernel_acc(scale_ref, a_ref, b_ref, o_ref, acc_ref, *,
                         K, tk, compute_dtype, mask_k):
    """Narrow-output path: f32 scratch accumulator, cast once in the epilogue."""
    k = pl.program_id(2)
    a = a_ref[...]
    b = b_ref[...]
    if mask_k:
        col = lax.broadcasted_iota(jnp.int32, a.shape, 1) + k * tk
        a = jnp.where(col < K, a, jnp.zeros_like(a))
        row = lax.broadcasted_iota(jnp.int32, b.shape, 0) + k * tk
        b = jnp.where(row < K, b, jnp.zeros_like(b))
    if compute_dtype is not None:
        a = a.astype(compute_dtype)
        b = b.astype(compute_dtype)
    partial = jnp.dot(a, b, preferred_element_type=jnp.float32)

    @pl.when(k == 0)
    def _():
        acc_ref[...] = partial

    @pl.when(k != 0)
    def _():
        acc_ref[...] += partial

    @pl.when(k == pl.num_programs(2) - 1)
    def _():
        o_ref[...] = (acc_ref[...] * scale_ref[0]).astype(o_ref.dtype)


def homomorphic_multiply(encrypted1, encrypted2, C1, scale=1.0, *,
                         tm=None, tn=None, tk=None,
                         compute_dtype=None, force_pallas=False):
    """Pallas equivalent of HomomorphicMultiply.forward (2-D matmul case).

    C1*scale is passed through SMEM (no recompile when it changes).
    compute_dtype=jnp.bfloat16 optionally casts the operands *inside the
    kernel* for the bf16 MXU path while keeping f32 accumulation.
    """
    if encrypted1.shape[1] != encrypted2.shape[0]:
        raise ValueError(
            "Input tensors must have compatible shapes for matrix multiplication."
        )
    M, K = encrypted1.shape
    _, N = encrypted2.shape
    out_dtype = jnp.result_type(encrypted1.dtype, encrypted2.dtype)
    scale_val = float(C1) * float(scale)

    # Tiny-problem bypass: a (1,1,1)-grid pallas_call carries fixed DMA +
    # launch overhead that dwarfs the compute; XLA's fused matmul wins there.
    if not force_pallas and 2 * M * N * K < 2_000_000:
        prod = jnp.dot(encrypted1, encrypted2,
                       preferred_element_type=jnp.float32)
        return (prod * scale_val).astype(out_dtype)

    gen = _tpu_generation()
    in_itemsize = jnp.dtype(encrypted1.dtype).itemsize
    out_itemsize = jnp.dtype(out_dtype).itemsize
    use_acc = out_dtype != jnp.float32

    # In-kernel cast only if it actually changes the dtype.
    if compute_dtype is not None and jnp.dtype(compute_dtype) == encrypted1.dtype:
        compute_dtype = None
    compute_itemsize = (jnp.dtype(compute_dtype).itemsize
                        if compute_dtype is not None else in_itemsize)

    # Generation-gated tile defaults: big enough to be MXU-bound, well inside
    # VMEM on every generation (f32 1024^2 x 512 working set ~ 16 MiB).
    base = 1024
    if gen is not None and gen <= 6 and compute_itemsize <= 2:
        base = 1536
    tm = base if tm is None else tm
    tn = base if tn is None else tn
    tk = 512 if tk is None else tk

    # Clamp tiles to full dims (full-dim blocks are always legal).
    tm = min(tm, M)
    tn = min(tn, N)
    tk = min(tk, K)

    vmem_cap = _vmem_capacity_bytes(gen)
    budget = int(vmem_cap * 0.55)

    def footprint(bm, bn, bk):
        f = 2 * (bm * bk + bk * bn) * in_itemsize   # double-buffered inputs
        f += 2 * bm * bn * out_itemsize             # double-buffered output
        if use_acc:
            f += bm * bn * 4                        # f32 accumulator scratch
        return f

    # Shrink tiles (largest first, K before N before M) if the working set
    # would overshoot this generation's VMEM; only halve 256-multiples so the
    # halves stay 128-aligned.
    while footprint(tm, tn, tk) > budget:
        if tk >= 256 and tk % 256 == 0 and tk >= max(tm, tn):
            tk //= 2
        elif tn >= 256 and tn % 256 == 0 and tn >= tm:
            tn //= 2
        elif tm >= 256 and tm % 256 == 0:
            tm //= 2
        else:
            break

    # v7x megacore: make sure both TensorCores get at least one output block.
    if gen is not None and gen >= 7:
        while pl.cdiv(M, tm) * pl.cdiv(N, tn) < 2:
            if tn >= 256 and tn % 256 == 0:
                tn //= 2
            elif tm >= 16 and tm % 16 == 0:
                tm //= 2
            else:
                break

    vmem_limit = int(max(footprint(tm, tn, tk) + 8 * _MIB, 64 * _MIB))
    vmem_limit = int(min(vmem_limit, vmem_cap - 2 * _MIB))

    grid = (pl.cdiv(M, tm), pl.cdiv(N, tn), pl.cdiv(K, tk))
    mask_k = (K % tk) != 0

    common = dict(K=K, tk=tk, compute_dtype=compute_dtype, mask_k=mask_k)
    if use_acc:
        kernel = functools.partial(_mm_scale_kernel_acc, **common)
        scratch = [pltpu.VMEM((tm, tn), jnp.float32)]
    else:
        kernel = functools.partial(_mm_scale_kernel_inplace, **common)
        scratch = []

    cost = pl.CostEstimate(
        flops=2 * M * N * K,
        transcendentals=0,
        bytes_accessed=(M * K + K * N) * in_itemsize + M * N * out_itemsize,
    )

    scale_arr = jnp.asarray([scale_val], dtype=jnp.float32)

    return pl.pallas_call(
        kernel,
        out_shape=jax.ShapeDtypeStruct((M, N), out_dtype),
        grid_spec=pltpu.PrefetchScalarGridSpec(
            num_scalar_prefetch=0,
            grid=grid,
            in_specs=[
                pl.BlockSpec(memory_space=pltpu.MemorySpace.SMEM),     # C1*scale
                pl.BlockSpec((tm, tk), lambda i, j, k: (i, k)),
                pl.BlockSpec((tk, tn), lambda i, j, k: (k, j)),
            ],
            out_specs=pl.BlockSpec((tm, tn), lambda i, j, k: (i, j)),
            scratch_shapes=scratch,
        ),
        compiler_params=pltpu.CompilerParams(
            dimension_semantics=("parallel", "parallel", "arbitrary"),
            vmem_limit_bytes=vmem_limit,
        ),
        cost_estimate=cost,
    )(scale_arr, encrypted1, encrypted2)


if __name__ == "__main__":
    key = jax.random.PRNGKey(0)
    k1, k2, k3, k4, k5, k6 = jax.random.split(key, 6)

    C1 = 3.0
    scale = 2.0

    # --- Test 1: f32 in-place accumulation path, multi-tile grid so the
    # k-axis accumulation / SMEM-scale epilogue is exercised. ---
    M, K, N = 64, 256, 256
    a = jax.random.normal(k1, (M, K), dtype=jnp.float32)
    b = jax.random.normal(k2, (K, N), dtype=jnp.float32)
    out = homomorphic_multiply(a, b, C1, scale,
                               tm=64, tn=128, tk=128, force_pallas=True)
    out = jax.block_until_ready(out)
    ref = (a @ b) * C1 * scale
    assert out.shape == (M, N)
    assert jnp.allclose(out, ref, atol=1e-4, rtol=1e-4), "f32 kernel mismatch"

    # --- Test 2: bf16 inputs/output exercise the scratch-accumulator path. ---
    a16 = a.astype(jnp.bfloat16)
    b16 = b.astype(jnp.bfloat16)
    out16 = homomorphic_multiply(a16, b16, C1, scale,
                                 tm=64, tn=128, tk=128, force_pallas=True)
    out16 = jax.block_until_ready(out16)
    ref16 = ((a16.astype(jnp.float32) @ b16.astype(jnp.float32))
             * C1 * scale).astype(jnp.bfloat16)
    assert jnp.allclose(out16.astype(jnp.float32), ref16.astype(jnp.float32),
                        atol=1e-1, rtol=1e-2), "bf16 kernel mismatch"

    # --- Test 3: ragged K (K % tk != 0) exercises the contraction-tail mask. ---
    Kr = 192
    ar = jax.random.normal(k3, (M, Kr), dtype=jnp.float32)
    br = jax.random.normal(k4, (Kr, N), dtype=jnp.float32)
    out_r = homomorphic_multiply(ar, br, C1, scale,
                                 tm=64, tn=128, tk=128, force_pallas=True)
    out_r = jax.block_until_ready(out_r)
    ref_r = (ar @ br) * C1 * scale
    assert jnp.allclose(out_r, ref_r, atol=1e-4, rtol=1e-4), "ragged-K mismatch"

    # --- Test 4: in-kernel bf16 MXU cast path (f32 in HBM, bf16 operands). ---
    out_c = homomorphic_multiply(a, b, C1, scale,
                                 tm=64, tn=128, tk=128,
                                 compute_dtype=jnp.bfloat16, force_pallas=True)
    out_c = jax.block_until_ready(out_c)
    assert jnp.allclose(out_c, ref, atol=2.0, rtol=5e-2), "bf16-compute mismatch"

    # --- Test 5: tiny-shape fast path (bypasses Pallas). ---
    Ms, Ks, Ns = 32, 64, 128
    a_s = jax.random.normal(k5, (Ms, Ks), dtype=jnp.float32)
    b_s = jax.random.normal(k6, (Ks, Ns), dtype=jnp.float32)
    out_s = jax.block_until_ready(homomorphic_multiply(a_s, b_s, C1, scale))
    ref_s = (a_s @ b_s) * C1 * scale
    assert jnp.allclose(out_s, ref_s, atol=1e-4, rtol=1e-4), "bypass mismatch"

    print("KERNEL_OK")
</pallas_src>

<mosaic_0001>
module attributes {stable_mosaic.version = 11 : i64} {
  func.func @_mm_scale_kernel_inplace(%arg0: i32, %arg1: i32, %arg2: i32, %arg3: memref<1xf32, #tpu.memory_space<smem>>, %arg4: memref<64x128xf32, #tpu.memory_space<vmem>>, %arg5: memref<128x128xf32, #tpu.memory_space<vmem>>, %arg6: memref<64x128xf32, #tpu.memory_space<vmem>>) attributes {dimension_semantics = [#tpu.dimension_semantics<parallel>, #tpu.dimension_semantics<parallel>, #tpu.dimension_semantics<arbitrary>], iteration_bounds = array<i64: 1, 2, 2>, scalar_prefetch = 0 : i64, scratch_operands = 0 : i64, tpu.core_type = #tpu.core_type<tc>, window_params = [{transform_indices = @transform_0, window_bounds = array<i64: 1>}, {transform_indices = @transform_1, window_bounds = array<i64: 64, 128>}, {transform_indices = @transform_2, window_bounds = array<i64: 128, 128>}, {transform_indices = @transform_3, window_bounds = array<i64: 64, 128>}]} {
    %c0 = arith.constant 0 : index
    %c0_0 = arith.constant 0 : index
    %0 = vector.load %arg4[%c0, %c0_0] : memref<64x128xf32, #tpu.memory_space<vmem>>, vector<64x128xf32>
    %c0_1 = arith.constant 0 : index
    %c0_2 = arith.constant 0 : index
    %1 = vector.load %arg5[%c0_1, %c0_2] : memref<128x128xf32, #tpu.memory_space<vmem>>, vector<128x128xf32>
    %cst = arith.constant dense<0.000000e+00> : vector<64x128xf32>
    %2 = tpu.matmul %0, %1, %cst {dimension_numbers = #tpu.dot_dimension_numbers<[1], [0], [0], [1], [0, 0, 1, 1], [], []>} : vector<64x128xf32>, vector<128x128xf32>, vector<64x128xf32> -> vector<64x128xf32>
    %c0_i32 = arith.constant 0 : i32
    %3 = arith.cmpi eq, %arg2, %c0_i32 : i32
    %4 = arith.extui %3 : i1 to i32
    %c0_i32_3 = arith.constant 0 : i32
    %5 = arith.cmpi ne, %4, %c0_i32_3 : i32
    scf.if %5 {
      %c0_7 = arith.constant 0 : index
      %c0_8 = arith.constant 0 : index
      %12 = vector.load %arg6[%c0_7, %c0_8] : memref<64x128xf32, #tpu.memory_space<vmem>>, vector<64x128xf32>
      tpu.vector_store %arg6[%c0_7, %c0_8], %2 {strides = array<i32>} : memref<64x128xf32, #tpu.memory_space<vmem>>, vector<64x128xf32>,
    } else {
    }
    %c0_i32_4 = arith.constant 0 : i32
    %6 = arith.cmpi ne, %arg2, %c0_i32_4 : i32
    %7 = arith.extui %6 : i1 to i32
    %c0_i32_5 = arith.constant 0 : i32
    %8 = arith.cmpi ne, %7, %c0_i32_5 : i32
    scf.if %8 {
      %c0_7 = arith.constant 0 : index
      %c0_8 = arith.constant 0 : index
      %12 = vector.load %arg6[%c0_7, %c0_8] : memref<64x128xf32, #tpu.memory_space<vmem>>, vector<64x128xf32>
      %13 = arith.addf %12, %2 : vector<64x128xf32>
      %c0_9 = arith.constant 0 : index
      %c0_10 = arith.constant 0 : index
      %14 = vector.load %arg6[%c0_9, %c0_10] : memref<64x128xf32, #tpu.memory_space<vmem>>, vector<64x128xf32>
      tpu.vector_store %arg6[%c0_9, %c0_10], %13 {strides = array<i32>} : memref<64x128xf32, #tpu.memory_space<vmem>>, vector<64x128xf32>,
    } else {
    }
    %c1_i32 = arith.constant 1 : i32
    %9 = arith.cmpi eq, %arg2, %c1_i32 : i32
    %10 = arith.extui %9 : i1 to i32
    %c0_i32_6 = arith.constant 0 : i32
    %11 = arith.cmpi ne, %10, %c0_i32_6 : i32
    scf.if %11 {
      %c0_7 = arith.constant 0 : index
      %c0_8 = arith.constant 0 : index
      %12 = vector.load %arg6[%c0_7, %c0_8] : memref<64x128xf32, #tpu.memory_space<vmem>>, vector<64x128xf32>
      %c0_9 = arith.constant 0 : index
      %13 = memref.load %arg3[%c0_9] : memref<1xf32, #tpu.memory_space<smem>>
      %14 = vector.broadcast %13 : f32 to vector<64x128xf32>
      %15 = arith.mulf %12, %14 : vector<64x128xf32>
      %c0_10 = arith.constant 0 : index
      %c0_11 = arith.constant 0 : index
      %16 = vector.load %arg6[%c0_10, %c0_11] : memref<64x128xf32, #tpu.memory_space<vmem>>, vector<64x128xf32>
      tpu.vector_store %arg6[%c0_10, %c0_11], %15 {strides = array<i32>} : memref<64x128xf32, #tpu.memory_space<vmem>>, vector<64x128xf32>,
    } else {
    }
    return
  }
  func.func @transform_0(%arg0: i32, %arg1: i32, %arg2: i32) -> i32 {
    %c0_i32 = arith.constant 0 : i32
    %c0_i32_0 = arith.constant 0 : i32
    return %c0_i32 : i32
  }
  func.func @transform_1(%arg0: i32, %arg1: i32, %arg2: i32) -> (i32, i32) {
    %c0_i32 = arith.constant 0 : i32
    return %arg0, %arg2 : i32, i32
  }
  func.func @transform_2(%arg0: i32, %arg1: i32, %arg2: i32) -> (i32, i32) {
    %c0_i32 = arith.constant 0 : i32
    return %arg2, %arg1 : i32, i32
  }
  func.func @transform_3(%arg0: i32, %arg1: i32, %arg2: i32) -> (i32, i32) {
    %c0_i32 = arith.constant 0 : i32
    return %arg0, %arg1 : i32, i32
  }
}

</mosaic_0001>

<bundles_post_ra>
// kernel: tpu_custom_call.1
= control target key start
LH: loop header
LB: loop body
LE: loop exit
PB: predicated region body
PF: predicated region fallthrough
CT: control target
= control target key end

     0   :  { %s1334_s0 = inlined_call_operand.<no memory space> [shape: f32[1], index: 0, kind: input, shape index: {}]   ;;  %s1335_s1 = inlined_call_operand.hbm [shape: f32[64,256], index: 1, kind: input, shape index: {}]   ;;  %s1336_s2 = inlined_call_operand.hbm [shape: f32[256,256], index: 2, kind: input, shape index: {}]   ;;  %s1337_s3 = inlined_call_operand.hbm [shape: f32[64,256], index: 3, kind: output, shape index: {}]  }
   0x1   :  { %1347 = sst [smem:[#allocation20_spill]] %s1335_s1 }
   0x2   :  { %1348 = sst [smem:[#allocation21_spill]] %s1337_s3 }
   0x3   :  { %8 = sst [smem:[#allocation2]] %s1334_s0 }
   0x4   :  { %9 = vsyncpa [#allocation4], 0 }
   0x5   :  { %11 = vsyncpa [#allocation4 + $0x1], 0 }
   0x6   :  { %12 = vsyncpa [#allocation7], 0 }
   0x7   :  { %14 = vsyncpa [#allocation7 + $0x1], 0 }
   0x8   :  { %15 = vsyncpa [#allocation5], 0 }
   0x9   :  { %17 = vsyncpa [#allocation5 + $0x1], 0  ;;  %s983_s14 = smov 0   ;;  %s985_s15 = smov 0  }
   0xa   :  { %s987_s16 = smov 0   ;;  %s989_s17 = smov 0  }
   0xb   :  { %s991_s18 = smov 0   ;;  %s993_s19 = smov 0  }
   0xc   :  { %s995_s20 = smov 0   ;;  %s997_s0 = smov 0  }
   0xd   :  { %s999_s21 = smov 0   ;;  %s1001_s22 = smov 0  }
   0xe   :  { %s1003_s23 = smov 0   ;;  %s1005_s24 = smov 0  }
   0xf   :  { %s1007_s25 = smov 0   ;;  %s1009_s26 = smov 0  }
  0x10 LB: > { %1349 = sst [smem:[#allocation12_spill]] %s920_s19  ;;  %s535_s27 = sadd.s32 4294967295, %s952_s26   ;;  %s952_s26 = sphi %s1009_s26, %s23_s26   ;;  %s948_s25 = sphi %s1007_s25, %s1392_s25   ;;  %s944_s24 = sphi %s1005_s24, %s1391_s24   ;;  %s940_s23 = sphi %s1003_s23, %s1390_s23   ;;  %s936_s22 = sphi %s1001_s22, %s1389_s22   ;;  %s932_s21 = sphi %s999_s21, %s1379_s21   ;;  %s928_s0 = sphi %s997_s0, %s1388_s0   ;;  %s924_s20 = sphi %s995_s20, %s1387_s20   ;;  %s920_s19 = sphi %s993_s19, %s1377_s19   ;;  %s916_s18 = sphi %s991_s18, %s1386_s18   ;;  %s912_s17 = sphi %s989_s17, %s1385_s17   ;;  %s908_s16 = sphi %s987_s16, %s1384_s16   ;;  %s904_s15 = sphi %s985_s15, %s1383_s15   ;;  %s900_s14 = sphi %s983_s14, %s1382_s14  }
  0x11   : > { %1350 = sst [smem:[#allocation13_spill]] %s932_s21  ;;  %s35_s28 = sadd.s32 1, %s944_s24 }
  0x12   : > { %1351 = sst [smem:[#allocation14_spill]] %s940_s23  ;;  %p1053_p0 = scmp.ge.s32.totalorder %s35_s28, 2 }
  0x13   : > { %s72_s30 = sadd.s32 1, %s932_s21  ;;  %p79_p1 = scmp.ne.s32.totalorder %s932_s21, %s928_s0 }
  0x14   : > { %p80_p2 = scmp.eq.s32.totalorder %s952_s26, 0  ;;  %s1394_s28 = smov (%p1053_p0, %s35_s28), 0 }
  0x15   : > { %1353 = sst [smem:[#allocation15_spill]] %s1394_s28  ;;  %p85_p4 = scmp.ne.s32.totalorder %s928_s0, %s924_s20 }
  0x16   : > { %p1067_p3 = por %p80_p2, %p79_p1  ;;  %s1074_s5 = ssub.s32 %s944_s24, %s1394_s28 }
  0x17   : > { %p1076_p5 = scmp.eq.s32.totalorder %s535_s27, 0  ;;  %p70_p6 = scmp.eq.s32.totalorder %s1074_s5, 0 }
  0x18   : > { %p1081_p7 = scmp.eq.s32.totalorder %s535_s27, 3  ;;  %p1340_p9 = scmp.lt.s32.totalorder %s952_s26, 4 }
  0x19   : > { %p1087_p8 = por %p1076_p5, %p85_p4  ;;  %s168_s10 = sand.u32 1, %s932_s21  }
  0x1a   : > { %s1092_s9 = scalar_select %p70_p6, %s932_s21, %s72_s30  }
  0x1b   : > { %s539_s11 = sshll.u32 %s168_s10, 6  ;;  %s540_s12 = sshll.u32 %s944_s24, 3 }
  0x1c   : > { %1358 = sst [smem:[#allocation16_spill]] %s1092_s9  ;;  %s172_s28 = scalar_lea.vmem [#allocation3], %s539_s11 }
  0x1d   : > { %s1359_s1 = sld [smem:[#allocation20_spill]]  ;;  %s182_s3 = sshll.u32 %s172_s28, 4  ;;  %s183_s3 = int_to_ptr.vmem [resolvable:$true] %s182_s3 }
  0x1e   : > { %p612_p10 = pnand %p1340_p9, %p1067_p3  ;;  %s169_s30 = scalar_lea.sflag [#allocation4], %s168_s10 }
  0x1f   : > { %s1342_s11 = smov 128   ;;  %s1343_s13 = smov 8  }
  0x20   : > { %p545_p11 = scmp.ge.s32.totalorder %s952_s26, 1  ;;  %p214_p12 = scmp.lt.s32.totalorder %s952_s26, 5 }
  0x21   : > { %s536_s4 = sadd.s32 4294967294, %s952_s26   ;;  %s38_s10 = sadd.s32 1, %s948_s25 }
  0x22   : > { %p1109_p13 = pnand %p545_p11, %p214_p12  ;;  %s100_s20 = sadd.s32 1, %s920_s19 }
  0x23   : > { %s179_s27 = scalar_lea.hbm %s1359_s1, %s540_s12  ;;  %s1341_s12 = smov 256  }
  0x24   : > { %s180_s23 = sshll.u32 %s179_s27, 4  ;;  %s1396_s10 = smov (!%p1053_p0, %s38_s10), %s948_s25  ;;  %s181_s23 = int_to_ptr.hbm [resolvable:$true] %s180_s23 }
  0x25   : > { %614 = dma.hbm_to_vmem [thread:$0]  (!%p612_p10), %s181_s23, 1024, %s183_s3, %s169_s30, %s1341_s12, %s1342_s11, %s1343_s13  }
  0x26   : > { %p107_p1 = scmp.ne.s32.totalorder %s920_s19, %s916_s18  ;;  %p113_p3 = scmp.ne.s32.totalorder %s916_s18, %s912_s17 }
  0x27   : > { %p40_p4 = scmp.ge.s32.totalorder %s1396_s10, 2  ;;  %s128_s3 = sadd.s32 1, %s908_s16 }
  0x28   : > { %p1126_p6 = por %p107_p1, %p80_p2  ;;  %p1132_p10 = por %p113_p3, %p1076_p5 }
  0x29   : > { %s1398_s10 = smov (%p40_p4, %s1396_s10), 0  ;;  %p138_p0 = scmp.ne.s32.totalorder %s908_s16, %s904_s15 }
  0x2a   : > { %1363 = sst [smem:[#allocation17_spill]] %s1398_s10  ;;  %p144_p11 = scmp.ne.s32.totalorder %s904_s15, %s900_s14 }
  0x2b   : > { %s96_s17 = ssub.s32 %s948_s25, %s1398_s10  ;;  %p145_p12 = scmp.eq.s32.totalorder %s536_s4, 3 }
  0x2c   : > { %s97_s29 = sor.u32 %s96_s17, %s1074_s5  ;;  %p126_p2 = scmp.eq.s32.totalorder %s96_s17, 0 }
  0x2d   : > { %p98_p1 = scmp.eq.s32.totalorder %s97_s29, 0  ;;  %p1147_p9 = por %p1081_p7, %p138_p0 }
  0x2e   : > { %s1152_s30 = scalar_select %p126_p2, %s908_s16, %s128_s3  }
  0x2f   : > { %s1155_s12 = scalar_select %p98_p1, %s920_s19, %s100_s20  }
  0x30   : > { %1365 = sst [smem:[#allocation18_spill]] %s1152_s30  ;;  %p1157_p5 = por %p145_p12, %p144_p11 }
  0x31   : > { %1366 = sst [smem:[#allocation19_spill]] %s1155_s12  ;;  %s192_s13 = sand.u32 1, %s920_s19  }
  0x32   : > { %s541_s4 = sshll.u32 %s192_s13, 7  ;;  %s556_s5 = sshll.u32 %s944_s24, 5 }
  0x33   : > { %s201_s1 = sadd.s32 %s948_s25, %s556_s5  ;;  %s196_s10 = scalar_lea.vmem [#allocation6], %s541_s4 }
  0x34   : > { %s206_s17 = sshll.u32 %s196_s10, 4  ;;  %s544_s29 = sshll.u32 %s201_s1, 3  ;;  %s207_s17 = int_to_ptr.vmem [resolvable:$true] %s206_s17 }
  0x35   : > { %s203_s21 = scalar_lea.hbm %s1336_s2, %s544_s29  ;;  %p1368_p7 = scmp.lt.s32.totalorder %s952_s26, 4 }
  0x36   : > { %s204_s20 = sshll.u32 %s203_s21, 4  ;;  %s193_s3 = scalar_lea.sflag [#allocation7], %s192_s13  ;;  %s205_s20 = int_to_ptr.hbm [resolvable:$true] %s204_s20 }
  0x37   : > { %p615_p3 = pnand %p1368_p7, %p1126_p6  ;;  %s1369_s12 = smov 8  }
  0x38   : > { %s1370_s30 = smov 128   ;;  %s1371_s19 = smov 256  }
  0x39   : > { %617 = dma.hbm_to_vmem [thread:$0]  (!%p615_p3), %s205_s20, 2048, %s207_s17, %s193_s3, %s1371_s19, %s1370_s30, %s1369_s12  }
  0x3a   : > { %218 = sbr.rel (%p1109_p13) target bundleno = 307 (0x133), region = 32  ;;  %s220_s1 = sand.u32 (!%p1109_p13), 1, %s928_s0  }
  0x3b   : > { %s546_s10 = sshll.u32 (!%p1109_p13), %s220_s1, 6  ;;  %s221_s4 = scalar_lea.sflag (!%p1109_p13), [#allocation4], %s220_s1 }
  0x3c   : > { %s1177_s9 = scalar_lea.vmem (!%p1109_p13), [#allocation3], %s546_s10 }
  0x3f   : > { %887 = dma.done.wait (%p1087_p8), %s221_s4, 1024  }
  0x40   : > { %889 = vsyncadd (%p1087_p8), %s221_s4, 4294966272  ;;  %s230_s21 = sand.u32 1, %s916_s18  }
  0x41   : > { %s547_s13 = sshll.u32 %s230_s21, 7  ;;  %s231_s19 = scalar_lea.sflag [#allocation7], %s230_s21 }
  0x42   : > { %s1184_s12 = scalar_lea.vmem [#allocation6], %s547_s13 }
  0x43   : > { %891 = dma.done.wait (%p1132_p10), %s231_s19, 2048  }
  0x44   : > { %893 = vsyncadd (%p1132_p10), %s231_s19, 4294965248  ;;  %s260_s8 = sand.u32 1, %s904_s15   ;;  %v289_v0 = vld [vmem:[%s1184_s12 + $0x78] sm:$0xff]  ;;  %v288_v1 = vld [vmem:[%s1184_s12 + $0x70] sm:$0xff]  ;;  %p549_p8 = scmp.ne.s32.totalorder %s936_s22, 0 }
  0x45   : > { %s1193_s28 = sshll.u32 %s260_s8, 6  ;;  %558 = vmatpush.msra.mxu2 %v289_v0  ;;  %559 = vmatpush.msra.mxu3 %v289_v0  ;;  %v287_v2 = vld [vmem:[%s1184_s12 + $0x68] sm:$0xff]  ;;  %v286_v3 = vld [vmem:[%s1184_s12 + $0x60] sm:$0xff]  ;;  %v285_v4 = vld [vmem:[%s1184_s12 + $0x58] sm:$0xff] }
  0x46   : > { %290 = vmatpush.msra.mxu0 %v289_v0  ;;  %557 = vmatpush.msra.mxu1 %v289_v0  ;;  %v284_v5 = vld [vmem:[%s1184_s12 + $0x50] sm:$0xff]  ;;  %v283_v6 = vld [vmem:[%s1184_s12 + $0x48] sm:$0xff]  ;;  %v282_v7 = vld [vmem:[%s1184_s12 + $0x40] sm:$0xff]  ;;  %s1220_s23 = scalar_lea.vmem [#allocation8], %s1193_s28 }
  0x47   : > { %561 = vmatpush.msra.mxu2 %v288_v1  ;;  %562 = vmatpush.msra.mxu3 %v288_v1  ;;  %v281_v8 = vld [vmem:[%s1184_s12 + $0x38] sm:$0xff]  ;;  %v280_v9 = vld [vmem:[%s1184_s12 + $0x30] sm:$0xff]  ;;  %v279_v10 = vld [vmem:[%s1184_s12 + $0x28] sm:$0xff] }
  0x48   : > { %291 = vmatpush.msra.mxu0 %v288_v1  ;;  %560 = vmatpush.msra.mxu1 %v288_v1  ;;  %v278_v11 = vld [vmem:[%s1184_s12 + $0x20] sm:$0xff]  ;;  %v277_v12 = vld [vmem:[%s1184_s12 + $0x18] sm:$0xff]  ;;  %v276_v13 = vld [vmem:[%s1184_s12 + $0x10] sm:$0xff] }
  0x49   : > { %564 = vmatpush.msra.mxu2 %v287_v2  ;;  %565 = vmatpush.msra.mxu3 %v287_v2  ;;  %v275_v14 = vld [vmem:[%s1184_s12 + $0x8] sm:$0xff]  ;;  %v274_v15 = vld [vmem:[%s1184_s12] sm:$0xff]  ;;  %v272_v17 = vld [vmem:[%s1177_s9 + $0x30] sm:$0xff] }
  0x4a   : > { %292 = vmatpush.msra.mxu0 %v287_v2  ;;  %563 = vmatpush.msra.mxu1 %v287_v2  ;;  %v270_v16 = vld [vmem:[%s1177_s9 + $0x20] sm:$0xff]  ;;  %v268_v19 = vld [vmem:[%s1177_s9 + $0x10] sm:$0xff]  ;;  %v271_v20 = vld [vmem:[%s1177_s9 + $0x28] sm:$0xff] }
  0x4b   : > { %567 = vmatpush.msra.mxu2 %v286_v3  ;;  %568 = vmatpush.msra.mxu3 %v286_v3  ;;  %v266_v18 = vld [vmem:[%s1177_s9] sm:$0xff]  ;;  %v273_v21 = vld [vmem:[%s1177_s9 + $0x38] sm:$0xff]  ;;  %v267_v22 = vld [vmem:[%s1177_s9 + $0x8] sm:$0xff] }
  0x4c   : > { %293 = vmatpush.msra.mxu0 %v286_v3  ;;  %566 = vmatpush.msra.mxu1 %v286_v3  ;;  %v269_v23 = vld [vmem:[%s1177_s9 + $0x18] sm:$0xff] }
  0x4d   : > { %570 = vmatpush.msra.mxu2 %v285_v4  ;;  %571 = vmatpush.msra.mxu3 %v285_v4 }
  0x4e   : > { %294 = vmatpush.msra.mxu0 %v285_v4  ;;  %569 = vmatpush.msra.mxu1 %v285_v4 }
  0x4f   : > { %573 = vmatpush.msra.mxu2 %v284_v5  ;;  %574 = vmatpush.msra.mxu3 %v284_v5 }
  0x50   : > { %295 = vmatpush.msra.mxu0 %v284_v5  ;;  %572 = vmatpush.msra.mxu1 %v284_v5 }
  0x51   : > { %576 = vmatpush.msra.mxu2 %v283_v6  ;;  %577 = vmatpush.msra.mxu3 %v283_v6 }
  0x52   : > { %296 = vmatpush.msra.mxu0 %v283_v6  ;;  %575 = vmatpush.msra.mxu1 %v283_v6 }
  0x53   : > { %579 = vmatpush.msra.mxu2 %v282_v7  ;;  %580 = vmatpush.msra.mxu3 %v282_v7 }
  0x54   : > { %297 = vmatpush.msra.mxu0 %v282_v7  ;;  %578 = vmatpush.msra.mxu1 %v282_v7 }
  0x55   : > { %582 = vmatpush.msra.mxu2 %v281_v8  ;;  %583 = vmatpush.msra.mxu3 %v281_v8 }
  0x56   : > { %298 = vmatpush.msra.mxu0 %v281_v8  ;;  %581 = vmatpush.msra.mxu1 %v281_v8 }
  0x57   : > { %585 = vmatpush.msra.mxu2 %v280_v9  ;;  %586 = vmatpush.msra.mxu3 %v280_v9 }
  0x58   : > { %299 = vmatpush.msra.mxu0 %v280_v9  ;;  %584 = vmatpush.msra.mxu1 %v280_v9 }
  0x59   : > { %588 = vmatpush.msra.mxu2 %v279_v10  ;;  %589 = vmatpush.msra.mxu3 %v279_v10 }
  0x5a   : > { %300 = vmatpush.msra.mxu0 %v279_v10  ;;  %587 = vmatpush.msra.mxu1 %v279_v10 }
  0x5b   : > { %591 = vmatpush.msra.mxu2 %v278_v11  ;;  %592 = vmatpush.msra.mxu3 %v278_v11 }
  0x5c   : > { %301 = vmatpush.msra.mxu0 %v278_v11  ;;  %590 = vmatpush.msra.mxu1 %v278_v11 }
  0x5d   : > { %594 = vmatpush.msra.mxu2 %v277_v12  ;;  %595 = vmatpush.msra.mxu3 %v277_v12 }
  0x5e   : > { %302 = vmatpush.msra.mxu0 %v277_v12  ;;  %593 = vmatpush.msra.mxu1 %v277_v12 }
  0x5f   : > { %597 = vmatpush.msra.mxu2 %v276_v13  ;;  %598 = vmatpush.msra.mxu3 %v276_v13 }
  0x60   : > { %303 = vmatpush.msra.mxu0 %v276_v13  ;;  %596 = vmatpush.msra.mxu1 %v276_v13 }
  0x61   : > { %600 = vmatpush.msra.mxu2 %v275_v14  ;;  %601 = vmatpush.msra.mxu3 %v275_v14 }
  0x62   : > { %304 = vmatpush.msra.mxu0 %v275_v14  ;;  %599 = vmatpush.msra.mxu1 %v275_v14 }
  0x63   : > { %603 = vmatpush.msra.mxu2 %v274_v15  ;;  %604 = vmatpush.msra.mxu3 %v274_v15 }
  0x64   : > { %318 = vmatmul.f32.vlgmr.msra.gmra.mxu2 %v270_v16  ;;  %324 = vmatmul.f32.vlgmr.msra.gmra.mxu3 %v272_v17 }
  0x65   : > { %305 = vmatpush.msra.mxu0 %v274_v15  ;;  %602 = vmatpush.msra.mxu1 %v274_v15 }
  0x66   : > { %306 = vmatmul.f32.vlgmr.msra.gmra.mxu0 %v266_v18  ;;  %312 = vmatmul.f32.vlgmr.msra.gmra.mxu1 %v268_v19 }
  0x6c   : > { %321 = vmatmul.f32.gmra.mxu2 %v271_v20  ;;  %327 = vmatmul.f32.gmra.mxu3 %v273_v21 }
  0x6e   : > { %309 = vmatmul.f32.gmra.mxu0 %v267_v22  ;;  %315 = vmatmul.f32.gmra.mxu1 %v269_v23 }
  0xe3   : > { %v307_v24 = vpop.f32.mrf.mxu0  ;;  %v313_v25 = vpop.f32.mrf.mxu1 }
  0xe7   : > { %v319_v26 = vpop.f32.mrf.mxu2  ;;  %v325_v27 = vpop.f32.mrf.mxu3 }
  0xeb   : > { %v310_v28 = vpop.f32.mrf.mxu0  ;;  %v316_v29 = vpop.f32.mrf.mxu1  ;;  %334 = sbr.rel (%p549_p8) target bundleno = 248 (0xf8), region = 44 }
  0xef   : > { %v322_v30 = vpop.f32.mrf.mxu2  ;;  %v328_v31 = vpop.f32.mrf.mxu3 }
  0xf0   : > { %335 = vst [vmem:[%s1220_s23] sm:$0xff] %v307_v24 }
  0xf1   : > { %336 = vst [vmem:[%s1220_s23 + $0x8] sm:$0xff] %v310_v28 }
  0xf2   : > { %337 = vst [vmem:[%s1220_s23 + $0x10] sm:$0xff] %v313_v25 }
  0xf3   : > { %338 = vst [vmem:[%s1220_s23 + $0x18] sm:$0xff] %v316_v29 }
  0xf4   : > { %339 = vst [vmem:[%s1220_s23 + $0x20] sm:$0xff] %v319_v26 }
  0xf5   : > { %340 = vst [vmem:[%s1220_s23 + $0x28] sm:$0xff] %v322_v30 }
  0xf6   : > { %341 = vst [vmem:[%s1220_s23 + $0x30] sm:$0xff] %v325_v27 }
  0xf7   : > { %342 = vst [vmem:[%s1220_s23 + $0x38] sm:$0xff] %v328_v31 }
  0xf8 PF: > { %p550_p13 = scmp.eq.s32.totalorder %s936_s22, 0 }
  0xfa   : > { %346 = sbr.rel (%p550_p13) target bundleno = 266 (0x10a), region = 48 }
  0xff   : > { %v347_v32 = vld [vmem:[%s1220_s23] sm:$0xff]  ;;  %v348_v33 = vld [vmem:[%s1220_s23 + $0x8] sm:$0xff]  ;;  %v349_v34 = vld [vmem:[%s1220_s23 + $0x10] sm:$0xff] }
 0x100   : > { %v355_v35 = vadd.f32 %v347_v32, %v307_v24  ;;  %v356_v36 = vadd.f32 %v348_v33, %v310_v28  ;;  %v357_v37 = vadd.f32 %v349_v34, %v313_v25  ;;  %v350_v38 = vld [vmem:[%s1220_s23 + $0x18] sm:$0xff]  ;;  %v351_v39 = vld [vmem:[%s1220_s23 + $0x20] sm:$0xff]  ;;  %v352_v40 = vld [vmem:[%s1220_s23 + $0x28] sm:$0xff] }
 0x101   : > { %v358_v41 = vadd.f32 %v350_v38, %v316_v29  ;;  %v353_v42 = vld [vmem:[%s1220_s23 + $0x30] sm:$0xff]  ;;  %v359_v43 = vadd.f32 %v351_v39, %v319_v26  ;;  %v354_v44 = vld [vmem:[%s1220_s23 + $0x38] sm:$0xff]  ;;  %v360_v45 = vadd.f32 %v352_v40, %v322_v30 }
 0x102   : > { %363 = vst [vmem:[%s1220_s23] sm:$0xff] %v355_v35  ;;  %v361_v46 = vadd.f32 %v353_v42, %v325_v27  ;;  %v362_v47 = vadd.f32 %v354_v44, %v328_v31 }
 0x103   : > { %364 = vst [vmem:[%s1220_s23 + $0x8] sm:$0xff] %v356_v36 }
 0x104   : > { %365 = vst [vmem:[%s1220_s23 + $0x10] sm:$0xff] %v357_v37 }
 0x105   : > { %366 = vst [vmem:[%s1220_s23 + $0x18] sm:$0xff] %v358_v41 }
 0x106   : > { %367 = vst [vmem:[%s1220_s23 + $0x20] sm:$0xff] %v359_v43 }
 0x107   : > { %368 = vst [vmem:[%s1220_s23 + $0x28] sm:$0xff] %v360_v45 }
 0x108   : > { %369 = vst [vmem:[%s1220_s23 + $0x30] sm:$0xff] %v361_v46 }
 0x109   : > { %370 = vst [vmem:[%s1220_s23 + $0x38] sm:$0xff] %v362_v47 }
 0x10a PF: > { %p551_p4 = scmp.ne.s32.totalorder %s936_s22, 1 }
 0x10b   : > { %s383_s27 = sld [smem:[#allocation2]] (!%p551_p4) }
 0x10c   : > { %374 = sbr.rel (%p551_p4) target bundleno = 284 (0x11c), region = 52 }
 0x111   : > { %v375_v48 = vld [vmem:[%s1220_s23] sm:$0xff]  ;;  %v376_v49 = vld [vmem:[%s1220_s23 + $0x8] sm:$0xff]  ;;  %v377_v50 = vld [vmem:[%s1220_s23 + $0x10] sm:$0xff]  ;;  %v384_v52 = vstv %s383_s27 }
 0x112   : > { %v378_v51 = vld [vmem:[%s1220_s23 + $0x18] sm:$0xff]  ;;  %v379_v53 = vld [vmem:[%s1220_s23 + $0x20] sm:$0xff]  ;;  %v385_v54 = vmul.f32 %v384_v52, %v375_v48  ;;  %v386_v55 = vmul.f32 %v384_v52, %v376_v49  ;;  %v387_v56 = vmul.f32 %v384_v52, %v377_v50  ;;  %v380_v57 = vld [vmem:[%s1220_s23 + $0x28] sm:$0xff] }
 0x113   : > { %v388_v58 = vmul.f32 %v384_v52, %v378_v51  ;;  %v381_v59 = vld [vmem:[%s1220_s23 + $0x30] sm:$0xff]  ;;  %v389_v60 = vmul.f32 %v384_v52, %v379_v53  ;;  %v382_v61 = vld [vmem:[%s1220_s23 + $0x38] sm:$0xff]  ;;  %v390_v62 = vmul.f32 %v384_v52, %v380_v57 }
 0x114   : > { %393 = vst [vmem:[%s1220_s23] sm:$0xff] %v385_v54  ;;  %v391_v63 = vmul.f32 %v384_v52, %v381_v59  ;;  %v392_v0 = vmul.f32 %v384_v52, %v382_v61 }
 0x115   : > { %394 = vst [vmem:[%s1220_s23 + $0x8] sm:$0xff] %v386_v55 }
 0x116   : > { %395 = vst [vmem:[%s1220_s23 + $0x10] sm:$0xff] %v387_v56 }
 0x117   : > { %396 = vst [vmem:[%s1220_s23 + $0x18] sm:$0xff] %v388_v58 }
 0x118   : > { %397 = vst [vmem:[%s1220_s23 + $0x20] sm:$0xff] %v389_v60 }
 0x119   : > { %398 = vst [vmem:[%s1220_s23 + $0x28] sm:$0xff] %v390_v62 }
 0x11a   : > { %399 = vst [vmem:[%s1220_s23 + $0x30] sm:$0xff] %v391_v63 }
 0x11b   : > { %400 = vst [vmem:[%s1220_s23 + $0x38] sm:$0xff] %v392_v0 }
 0x11c PF: > { %s1372_s22 = sld [smem:[#allocation14_spill]]  ;;  %s416_s20 = sshll.u32 %s1220_s23, 4  ;;  %s417_s20 = int_to_ptr.vmem [resolvable:$true] %s416_s20 }
 0x11d   : > { %s1373_s29 = sld [smem:[#allocation21_spill]]  ;;  %s402_s1 = scalar_lea.sflag [#allocation5], %s260_s8 }
 0x122   : > { %s553_s30 = sshll.u32 %s1372_s22, 3 }
 0x123   : > { %s415_s7 = scalar_lea.hbm %s1373_s29, %s553_s30  ;;  %s822_s13 = scalar_lea.hbm %s1373_s29, 128 }
 0x124   : > { %s418_s3 = sshll.u32 %s415_s7, 4  ;;  %s419_s3 = int_to_ptr.hbm [resolvable:$true] %s418_s3 }
 0x125   : > { %s816_s10 = sshra.s32 %s419_s3, 4  ;;  %s817_s10 = int_to_ptr.hbm [resolvable:$true] %s816_s10 }
 0x126   : > { %s818_s4 = scalar_lea.hbm %s817_s10, 64  ;;  %p823_p11 = scmp.lt.s32.totalorder %s817_s10, %s1373_s29 }
 0x127   : > { %p819_p6 = scmp.ne.s32.totalorder %s817_s10, %s818_s4  ;;  %p824_p12 = scmp.lt.s32.totalorder %s822_s13, %s818_s4 }
 0x129   : > { %p820_p10 = pnand %p819_p6, %p1147_p9  ;;  %p825_p2 = por %p824_p12, %p823_p11 }
 0x12b   : > { %p821_p0 = pneg %p820_p10 }
 0x12d   : > { %p826_p1 = pnand %p825_p2, %p821_p0 }
 0x12f   : > { %829 = shalt.err (!%p826_p1)
}
 0x130   : > { %s957_s8 = smov 128   ;;  %s958_s28 = smov 256  }
 0x131   : > { %s959_s23 = smov 8  }
 0x132   : > { %609 = dma.vmem_to_hbm [thread:$0]  (%p1147_p9), %s417_s20, 1024, %s419_s3, %s402_s1, %s957_s8, %s958_s28, %s959_s23  }
 0x133 PF: > { %p623_p7 = scmp.ge.s32.totalorder %s952_s26, 2  ;;  %s433_s27 = sand.u32 1, %s900_s14  }
 0x134   : > { %s434_s22 = scalar_lea.sflag [#allocation5], %s433_s27 }
 0x135   : > { %p619_p3 = pnand %p623_p7, %p1157_p5 }
 0x137   : > { %p620_p8 = pneg %p619_p3 }
 0x139   : > { %895 = dma.done.wait (%p620_p8), %s434_s22, 1024  }
 0x13a   : > { %897 = vsyncadd (%p620_p8), %s434_s22, 4294966272  ;;  %s23_s26 = sadd.s32 1, %s952_s26   ;;  %s1375_s6 = sld [smem:[#allocation18_spill]] }
 0x13b   : > { %p1287_p13 = scmp.ge.s32.totalorder %s23_s26, 6   ;;  %s1376_s5 = sld [smem:[#allocation12_spill]] }
 0x13c   : > { %s1377_s19 = sld [smem:[#allocation19_spill]]  ;;  %s1382_s14 = smov %s904_s15 }
 0x13d   : > { %s1378_s7 = sld [smem:[#allocation13_spill]]  ;;  %s1383_s15 = smov %s908_s16 }
 0x13e   : > { %s1379_s21 = sld [smem:[#allocation16_spill]]  ;;  %s1385_s17 = smov %s916_s18 }
 0x13f   : > { %s1380_s11 = sld [smem:[#allocation15_spill]]  ;;  %s1387_s20 = smov %s928_s0 }
 0x140   : > { %s1381_s3 = sld [smem:[#allocation17_spill]]  ;;  %s1384_s16 = smov %s1375_s6 }
 0x141   : > { %s1386_s18 = smov %s1376_s5  ;;  %s1389_s22 = smov %s944_s24 }
 0x142   : > { %s1390_s23 = smov %s948_s25  ;;  %22 = sbr.rel (!%p1287_p13) target bundleno = 16 (0x10), region = 102 }
 0x143   : > { %s1388_s0 = smov %s1378_s7 }
 0x145   : > { %s1391_s24 = smov %s1380_s11 }
 0x146   : > { %s1392_s25 = smov %s1381_s3 }
 0x147   :  { %440 = vsyncpa [#allocation4], 1 }
 0x148   :  { %442 = vsyncpa [#allocation4 + $0x1], 1 }
 0x149   :  { %443 = vsyncpa [#allocation7], 1 }
 0x14a   :  { %445 = vsyncpa [#allocation7 + $0x1], 1 }
 0x14b   :  { %446 = vsyncpa [#allocation5], 1 }
 0x14c   :  { %448 = vsyncpa [#allocation5 + $0x1], 1 }

</bundles_post_ra>
